<compile_context>
chip_gen: v5e
topology: v5e:2x2
jax: 0.10.0
libtpu: 0.0.40
codegen_flags: <defaults>
</compile_context>

<pallas_src>
import jax
import jax.numpy as jnp
from jax.experimental import pallas as pl
from jax.experimental.pallas import tpu as pltpu


def _clip_kernel(bounds_ref, x_ref, o_ref):
    # bounds_ref: SMEM (2,) float32 -> [max_value, min_value]
    max_v = bounds_ref[0].astype(o_ref.dtype)
    min_v = bounds_ref[1].astype(o_ref.dtype)
    o_ref[...] = jnp.maximum(jnp.minimum(x_ref[...], max_v), min_v)


def clipping(x, max_value, min_value):
    """Element-wise clip of `x` to [min_value, max_value].

    x: float array of any shape / dtype.
    max_value, min_value: python / JAX scalars (per-tensor thresholds).
    """
    orig_shape = x.shape
    orig_dtype = x.dtype
    n = x.size
    if n == 0:
        return x

    flat = x.reshape(-1)

    # Lane-dense last dim: prefer a width that divides n exactly (no pad, no
    # trailing slice); otherwise use 128 lanes to keep padding minimal.
    LANES = 128
    for cand in (1024, 512, 256):
        if n % cand == 0:
            LANES = cand
            break

    rows = -(-n // LANES)
    padded_n = rows * LANES
    if padded_n != n:
        flat = jnp.pad(flat, (0, padded_n - n))   # at most LANES-1 elements
    x2d = flat.reshape(rows, LANES)

    # dtype-aware block size: ~4 MiB per block, rows a multiple of 8.
    itemsize = jnp.dtype(orig_dtype).itemsize
    TARGET_BLOCK_BYTES = 4 << 20
    block_rows = max(8, (TARGET_BLOCK_BYTES // (LANES * itemsize)) // 8 * 8)
    if block_rows >= rows:
        block_rows = rows                         # single full-array block
    grid = (-(-rows // block_rows),)              # last block may be partial

    bounds = jnp.asarray([max_value, min_value], dtype=jnp.float32)

    out2d = pl.pallas_call(
        _clip_kernel,
        out_shape=jax.ShapeDtypeStruct((rows, LANES), orig_dtype),
        grid=grid,
        in_specs=[
            pl.BlockSpec(memory_space=pltpu.MemorySpace.SMEM),    # scalars
            pl.BlockSpec((block_rows, LANES), lambda i: (i, 0)),  # x tile
        ],
        out_specs=pl.BlockSpec((block_rows, LANES), lambda i: (i, 0)),
        compiler_params=pltpu.CompilerParams(
            dimension_semantics=("parallel",),
            vmem_limit_bytes=48 << 20),
    )(bounds, x2d)

    if padded_n != n:
        return out2d.reshape(-1)[:n].reshape(orig_shape)
    return out2d.reshape(orig_shape)


def _reference(x, max_value, min_value):
    # Mirrors the kernel semantics: bounds cast once to the input dtype,
    # compare natively in that dtype.
    max_v = jnp.asarray(max_value, dtype=jnp.float32).astype(x.dtype)
    min_v = jnp.asarray(min_value, dtype=jnp.float32).astype(x.dtype)
    return jnp.maximum(jnp.minimum(x, max_v), min_v)


if __name__ == "__main__":
    key = jax.random.PRNGKey(0)
    # NCHW input, small shapes consistent with the module's typical use
    x = jax.random.normal(key, (2, 4, 16, 16), dtype=jnp.float32)

    max_value = 0.7
    min_value = -0.4

    out = jax.block_until_ready(clipping(x, max_value, min_value))
    ref = _reference(x, max_value, min_value)
    assert out.shape == x.shape and out.dtype == x.dtype
    assert jnp.array_equal(out, ref), "f32 mismatch vs reference"

    # Also exercise a ragged (non-multiple-of-128) element count and bf16.
    x2 = jax.random.normal(jax.random.PRNGKey(1), (3, 5, 7, 11),
                           dtype=jnp.bfloat16)
    out2 = jax.block_until_ready(clipping(x2, max_value, min_value))
    ref2 = _reference(x2, max_value, min_value)
    assert out2.shape == x2.shape and out2.dtype == x2.dtype
    assert jnp.array_equal(out2, ref2), "bf16 / ragged mismatch vs reference"

    print("KERNEL_OK")
</pallas_src>

<mosaic_0001>
module attributes {stable_mosaic.version = 11 : i64} {
  func.func @_clip_kernel(%arg0: i32, %arg1: memref<2xf32, #tpu.memory_space<smem>>, %arg2: memref<2x1024xf32, #tpu.memory_space<vmem>>, %arg3: memref<2x1024xf32, #tpu.memory_space<vmem>>) attributes {dimension_semantics = [#tpu.dimension_semantics<parallel>], iteration_bounds = array<i64: 1>, scalar_prefetch = 0 : i64, scratch_operands = 0 : i64, tpu.core_type = #tpu.core_type<tc>, window_params = [{transform_indices = @transform_0, window_bounds = array<i64: 2>}, {transform_indices = @transform_1, window_bounds = array<i64: 2, 1024>}, {transform_indices = @transform_2, window_bounds = array<i64: 2, 1024>}]} {
    %c0 = arith.constant 0 : index
    %0 = memref.load %arg1[%c0] : memref<2xf32, #tpu.memory_space<smem>>
    %c1 = arith.constant 1 : index
    %1 = memref.load %arg1[%c1] : memref<2xf32, #tpu.memory_space<smem>>
    %c0_0 = arith.constant 0 : index
    %c0_1 = arith.constant 0 : index
    %2 = vector.load %arg2[%c0_0, %c0_1] : memref<2x1024xf32, #tpu.memory_space<vmem>>, vector<2x1024xf32>
    %3 = vector.broadcast %0 : f32 to vector<2x1024xf32>
    %4 = arith.minimumf %2, %3 : vector<2x1024xf32>
    %5 = vector.broadcast %1 : f32 to vector<2x1024xf32>
    %6 = arith.maximumf %4, %5 : vector<2x1024xf32>
    %c0_2 = arith.constant 0 : index
    %c0_3 = arith.constant 0 : index
    %7 = vector.load %arg3[%c0_2, %c0_3] : memref<2x1024xf32, #tpu.memory_space<vmem>>, vector<2x1024xf32>
    tpu.vector_store %arg3[%c0_2, %c0_3], %6 {strides = array<i32>} : memref<2x1024xf32, #tpu.memory_space<vmem>>, vector<2x1024xf32>,
    return
  }
  func.func @transform_0(%arg0: i32) -> i32 {
    %c0_i32 = arith.constant 0 : i32
    %c0_i32_0 = arith.constant 0 : i32
    return %c0_i32 : i32
  }
  func.func @transform_1(%arg0: i32) -> (i32, i32) {
    %c0_i32 = arith.constant 0 : i32
    %c0_i32_0 = arith.constant 0 : i32
    return %arg0, %c0_i32 : i32, i32
  }
  func.func @transform_2(%arg0: i32) -> (i32, i32) {
    %c0_i32 = arith.constant 0 : i32
    %c0_i32_0 = arith.constant 0 : i32
    return %arg0, %c0_i32 : i32, i32
  }
}

</mosaic_0001>

<bundles_post_ra>
// kernel: tpu_custom_call.1
= control target key start
LH: loop header
LB: loop body
LE: loop exit
PB: predicated region body
PF: predicated region fallthrough
CT: control target
= control target key end

     0   :  { %7 = vsyncpa [#allocation5], 0  ;;  %s166_s0 = inlined_call_operand.hbm [shape: f32[2], index: 0, kind: input, shape index: {}]   ;;  %s167_s1 = inlined_call_operand.hbm [shape: f32[2,1024], index: 1, kind: input, shape index: {}]   ;;  %s168_s2 = inlined_call_operand.hbm [shape: f32[2,1024], index: 2, kind: output, shape index: {}]  }
   0x1   :  { %8 = vsyncpa [#allocation3], 0 }
   0x2   :  { %9 = vsyncpa [#allocation4], 0  ;;  %s15_s11 = sshll.u32 %s166_s0, 4  ;;  %s24_s14 = sshll.u32 %s167_s1, 4  ;;  %s16_s11 = int_to_ptr.hbm [resolvable:$true] %s15_s11  ;;  %s25_s14 = int_to_ptr.hbm [resolvable:$true] %s24_s14 }
   0x3   :  { %s139_s15 = smov [#allocation2]   ;;  %s140_s16 = smov [#allocation6]  }
   0x4   :  { %18 = dma.hbm_to_smem %s16_s11, 16, %s139_s15, [#allocation5]  }
   0x5   :  { %s26_s17 = sshll.u32 %s140_s16, 4  ;;  %s27_s17 = int_to_ptr.vmem [resolvable:$true] %s26_s17 }
   0x6   :  { %29 = dma.hbm_to_vmem [thread:$0]  %s25_s14, 256, %s27_s17, [#allocation3]  }
   0x7   :  { %133 = dma.done.wait [#allocation5], 16  }
   0x8   :  { %134 = vsyncadd [#allocation5], 4294967280 }
   0x9   :  { %135 = dma.done.wait [#allocation3], 256  }
   0xa   :  { %136 = vsyncadd [#allocation3], 4294967040 }
   0xb   :  { %38 = sfence }
   0xc   :  { %s39_s18 = sld [smem:[#allocation2]]  ;;  %v41_v0 = vld [vmem:[#allocation6] sm:$0xff]  ;;  %v42_v1 = vld [vmem:[#allocation6 + $0x8] sm:$0xff]  ;;  %s141_s0 = smov [#allocation7]  }
   0xd   :  { %s69_s19 = sld [smem:[#allocation2 + $0x1]]  ;;  %s56_s1 = sshll.u32 %s141_s0, 4  ;;  %s57_s1 = int_to_ptr.vmem [resolvable:$true] %s56_s1 }
   0xe   :  { %s58_s22 = sshll.u32 %s168_s2, 4  ;;  %s59_s22 = int_to_ptr.hbm [resolvable:$true] %s58_s22 }
  0x12   :  { %v43_v2 = vstv %s39_s18 }
  0x13   :  { %v44_v3 = vmin.f32 %v41_v0, %v43_v2  ;;  %v46_v4 = vstv %s69_s19  ;;  %v45_v5 = vmin.f32 %v42_v1, %v43_v2 }
  0x15   :  { %v47_v6 = vmax.f32 %v44_v3, %v46_v4  ;;  %v48_v7 = vmax.f32 %v45_v5, %v46_v4 }
  0x17   :  { %49 = vst [vmem:[#allocation7] sm:$0xff] %v47_v6 }
  0x18   :  { %50 = vst [vmem:[#allocation7 + $0x8] sm:$0xff] %v48_v7 }
  0x19   :  { %61 = dma.vmem_to_hbm [thread:$0]  %s57_s1, 256, %s59_s22, [#allocation4]  }
  0x1a   :  { %137 = dma.done.wait [#allocation4], 256  }
  0x1b   :  { %138 = vsyncadd [#allocation4], 4294967040 }
  0x1c   :  { %66 = vsyncpa [#allocation3], 1 }
  0x1d   :  { %67 = vsyncpa [#allocation4], 1 }
  0x1e   :  { %68 = vsyncpa [#allocation5], 1 }

</bundles_post_ra>
